<compile_context>
chip_gen: v5e
topology: v5e:2x2
jax: 0.10.0
libtpu: 0.0.40
codegen_flags: <defaults>
</compile_context>

<pallas_src>
import functools

import jax
import jax.numpy as jnp
from jax import lax
from jax.experimental import pallas as pl
from jax.experimental.pallas import tpu as pltpu


def _round_up(x, m):
    return (x + m - 1) // m * m


def _sublane_multiple(dtype):
    # sublane packing: 4-byte -> 8 rows, 2-byte -> 16, 1-byte -> 32
    return max(8, 32 // jnp.dtype(dtype).itemsize)


def _attn_dot_kernel(h_ref, enc_ref, out_ref, scores_ref, *,
                     h_step, scores_transposed):
    """One (B tile, L chunk) grid step.

    h_ref:      (1, B_TILE, H)        decoder hidden (native layout)
    enc_ref:    (L_TILE, B_TILE, H)   encoder chunk  (native layout)
    out_ref:    (B_TILE, L)           attention weights, resident across L axis
    scores_ref: (B_TILE, L_PAD) f32   raw scores, L on lanes  (transposed path)
                (L_PAD, B_TILE) f32                           (fallback path)
    """
    j = pl.program_id(1)
    num_l = pl.num_programs(1)
    l_tile, b_tile, H = enc_ref.shape
    seq_len = out_ref.shape[1]                       # true L (may be < L_PAD)
    l_pad = scores_ref.shape[1] if scores_transposed else scores_ref.shape[0]

    # ---- score contraction over H, in bounded lane chunks -------------------
    # sum_h enc[l,b,h] * hid[b,h] accumulated in f32.  Chunking H keeps every
    # intermediate (the promoted product of one H slice) bounded to
    # l_tile*b_tile*h_step f32 instead of a full-chunk f32 product in VMEM.
    h_full = h_ref[...].astype(jnp.float32)          # (1, b_tile, H), tiny
    s = jnp.zeros((l_tile, b_tile), jnp.float32)
    for h0 in range(0, H, h_step):
        hs = min(h_step, H - h0)
        e_sl = enc_ref[:, :, h0:h0 + hs]             # native dtype slice
        h_sl = h_full[:, :, h0:h0 + hs]
        s = s + jnp.sum(e_sl * h_sl, axis=2)         # f32 accumulation

    # ---- stage raw scores for this chunk ------------------------------------
    if scores_transposed:
        if l_pad == l_tile:                          # single L chunk
            scores_ref[...] = s.T
        else:
            # l_tile % 128 == 0 by construction -> unmasked lane-offset store;
            # per-chunk XLU transpose hides under the next chunk's DMA.
            start = pl.multiple_of(j * l_tile, 128)
            scores_ref[:, pl.ds(start, l_tile)] = s.T
    else:
        start = j * l_tile
        if l_tile % 8 == 0:
            start = pl.multiple_of(start, 8)
        scores_ref[pl.ds(start, l_tile), :] = s

    # ---- softmax over the full sequence, once per B tile --------------------
    @pl.when(j == num_l - 1)
    def _finalize():
        sc = scores_ref[...] if scores_transposed else scores_ref[...].T
        if l_pad != seq_len:                         # static: mask padded tail
            col = lax.broadcasted_iota(jnp.int32, sc.shape, 1)
            sc = jnp.where(col < seq_len, sc, -jnp.inf)
        m = jnp.max(sc, axis=1, keepdims=True)
        e = jnp.exp(sc - m)
        d = jnp.sum(e, axis=1, keepdims=True)
        r = pl.reciprocal(d, approx=True)            # EUP slot
        r = r * (2.0 - d * r)                        # Newton step -> f32 accuracy
        p = e * r
        if l_pad != seq_len:
            p = p[:, :seq_len]
        out_ref[...] = p.astype(out_ref.dtype)


def attention_dot(hidden, encoder_outputs, *, b_tile=None, l_tile=None,
                  h_step=None):
    """hidden: (1, B, H), encoder_outputs: (L, B, H) -> (B, 1, L)."""
    L, B, H = encoder_outputs.shape
    assert hidden.shape == (1, B, H), (hidden.shape, encoder_outputs.shape)

    enc_dt = encoder_outputs.dtype
    out_dt = hidden.dtype
    in_isz = jnp.dtype(enc_dt).itemsize
    hid_isz = jnp.dtype(hidden.dtype).itemsize
    out_isz = jnp.dtype(out_dt).itemsize

    # ---- generation-aware budgets -------------------------------------------
    try:
        vmem_cap = int(getattr(pltpu.get_tpu_info(), "vmem_capacity_bytes", 0) or 0)
    except Exception:
        vmem_cap = 0
    if vmem_cap and vmem_cap > (64 << 20):
        # v5e / v6e class: 128 MiB physical VMEM.  8 MiB chunks already sit at
        # ~90%+ of the HBM roofline; explicit limit clears the 16/32 MiB
        # scoped defaults with room to spare.
        chunk_target, vmem_limit = 8 << 20, 64 << 20
    elif vmem_cap:
        # v7x class: 64 MiB physical VMEM, 3.2 TB/s HBM -> bigger chunks cut
        # the ~0.35 us/step overhead below 10%; leave headroom under 64 MiB.
        chunk_target, vmem_limit = 12 << 20, 48 << 20
    else:
        # Unknown generation: settings that are safe everywhere.
        chunk_target, vmem_limit = 8 << 20, 40 << 20
    temp_budget = 2 << 20            # per-H-slice f32 product intermediate
    slack = 2 << 20

    sub_in = _sublane_multiple(enc_dt)
    sub_out = _sublane_multiple(out_dt)
    h_pad = _round_up(H, 128)

    # ---- batch tile ----------------------------------------------------------
    # For B > 8 keep num_b >= 2 so the "parallel" B axis can be split across
    # both TensorCores on dual-core chips (v7x); capped at 64 rows so the
    # re-fetched hidden block stays small vs. each encoder chunk.
    if b_tile is None:
        b_tile = B if B <= 8 else min(64, _round_up(pl.cdiv(B, 2), 8))
    b_tile = max(1, min(int(b_tile), B))

    # ---- L chunk -------------------------------------------------------------
    def pick_l_tile(bt):
        # lane/sublane-padded bytes per encoder L row (true VMEM footprint)
        per_l = _round_up(bt, sub_in) * h_pad * in_isz
        raw = max(1, chunk_target // per_l)
        if raw >= L:
            return L                              # single chunk
        if raw >= 128:
            return (raw // 128) * 128             # lane-aligned chunked stores
        return max(8, (raw // 8) * 8)             # sublane-aligned, never < 8

    user_l_tile = l_tile is not None
    if user_l_tile:
        l_tile = max(1, min(int(l_tile), L))
        if 8 < l_tile < L:
            l_tile = (l_tile // 8) * 8            # keep chunk starts aligned
    else:
        l_tile = pick_l_tile(b_tile)
        # For extreme H prefer shrinking the batch tile over a tiny L chunk.
        while l_tile < 128 and l_tile < L and b_tile > 8:
            b_tile = max(8, b_tile // 2)
            l_tile = pick_l_tile(b_tile)

    num_b = pl.cdiv(B, b_tile)
    num_l = pl.cdiv(L, l_tile)
    l_pad = num_l * l_tile
    scores_transposed = (num_l == 1) or (l_tile % 128 == 0)

    # ---- H chunk for the in-kernel contraction -------------------------------
    if h_step is None:
        if H <= 128:
            h_step = H
        else:
            cap = temp_budget // max(1, l_tile * _round_up(b_tile, 8) * 4)
            h_step = int(min(512, max(128, (cap // 128) * 128)))
    h_step = max(1, min(int(h_step), H))

    # ---- VMEM accounting (padded block sizes + contraction temporaries) ------
    def vmem_estimate(lt, bt, hs, transposed):
        enc_blk = lt * _round_up(bt, sub_in) * h_pad * in_isz
        hid_blk = _round_up(bt, _sublane_multiple(hidden.dtype)) * h_pad * hid_isz
        out_blk = _round_up(bt, sub_out) * _round_up(L, 128) * out_isz
        lp = pl.cdiv(L, lt) * lt
        if transposed:
            scr = _round_up(bt, 8) * _round_up(lp, 128) * 4
        else:
            scr = _round_up(lp, 8) * _round_up(bt, 128) * 4
        s_val = _round_up(lt, 8) * _round_up(bt, 128) * 4       # (lt, bt) f32
        prod = lt * _round_up(bt, 8) * _round_up(hs, 128) * 4   # per-H-slice temp
        return 2 * enc_blk + 2 * hid_blk + 2 * out_blk + scr + 2 * s_val + 2 * prod

    if not user_l_tile:
        while (vmem_estimate(l_tile, b_tile, h_step, scores_transposed) + slack
               > vmem_limit and l_tile > 8):
            l_tile = max(8, l_tile // 2)
            if l_tile >= 128:
                l_tile = (l_tile // 128) * 128
            else:
                l_tile = max(8, (l_tile // 8) * 8)
            num_l = pl.cdiv(L, l_tile)
            l_pad = num_l * l_tile
            scores_transposed = (num_l == 1) or (l_tile % 128 == 0)

    needed = vmem_estimate(l_tile, b_tile, h_step, scores_transposed) + slack
    hard_cap = (vmem_cap - (4 << 20)) if vmem_cap else (60 << 20)
    vmem_limit = int(min(max(vmem_limit, needed), max(hard_cap, 16 << 20)))

    # ---- pallas call ----------------------------------------------------------
    kernel = functools.partial(_attn_dot_kernel, h_step=h_step,
                               scores_transposed=scores_transposed)
    if scores_transposed:
        scratch = [pltpu.VMEM((b_tile, l_pad), jnp.float32)]
    else:
        scratch = [pltpu.VMEM((l_pad, b_tile), jnp.float32)]

    grid_spec = pltpu.PrefetchScalarGridSpec(
        num_scalar_prefetch=0,
        grid=(num_b, num_l),
        in_specs=[
            # decoder hidden, native (1, B, H) layout
            pl.BlockSpec((1, b_tile, H), lambda i, j: (0, i, 0)),
            # encoder outputs, native (L, B, H) layout: chunk j of batch tile i
            pl.BlockSpec((l_tile, b_tile, H), lambda i, j: (j, i, 0)),
        ],
        # lane-dense (b_tile, L) output block, resident across the L axis
        out_specs=pl.BlockSpec((b_tile, L), lambda i, j: (i, 0)),
        scratch_shapes=scratch,
    )

    cost = pl.CostEstimate(
        flops=2 * L * B * H,
        transcendentals=B * L,
        bytes_accessed=L * B * H * in_isz + B * H * hid_isz + B * L * out_isz,
    )

    weights = pl.pallas_call(
        kernel,
        out_shape=jax.ShapeDtypeStruct((B, L), out_dt),
        grid_spec=grid_spec,
        compiler_params=pltpu.CompilerParams(
            dimension_semantics=("parallel", "arbitrary"),
            vmem_limit_bytes=vmem_limit),
        cost_estimate=cost,
    )(hidden, encoder_outputs)

    # (B, L) -> (B, 1, L): metadata-only reshape == softmax(...).unsqueeze(1)
    return weights[:, None, :]


def attention_dot_ref(hidden, encoder_outputs):
    """Pure-JAX reference mirroring the PyTorch code exactly."""
    scores = jnp.sum(hidden * encoder_outputs, axis=2)     # (L, B)
    return jax.nn.softmax(scores.T, axis=1)[:, None, :]    # (B, 1, L)


if __name__ == "__main__":
    key = jax.random.PRNGKey(0)
    ks = jax.random.split(key, 8)

    # Case 1: module-sized demo (single chunk, transposed-scratch path).
    B, L, H = 2, 8, 32
    hidden = jax.random.normal(ks[0], (1, B, H), dtype=jnp.float32)
    enc = jax.random.normal(ks[1], (L, B, H), dtype=jnp.float32)
    out = jax.block_until_ready(attention_dot(hidden, enc))
    ref = attention_dot_ref(hidden, enc)
    assert out.shape == (B, 1, L), out.shape
    assert jnp.allclose(out, ref, atol=1e-4, rtol=1e-4), "case 1 mismatch"

    # Case 2: B tiling + L chunking + ragged-L masking (fallback scratch path).
    B2, L2, H2 = 16, 40, 128
    hidden2 = jax.random.normal(ks[2], (1, B2, H2), dtype=jnp.float32)
    enc2 = jax.random.normal(ks[3], (L2, B2, H2), dtype=jnp.float32)
    out2 = jax.block_until_ready(attention_dot(hidden2, enc2, b_tile=8, l_tile=16))
    ref2 = attention_dot_ref(hidden2, enc2)
    assert out2.shape == (B2, 1, L2), out2.shape
    assert jnp.allclose(out2, ref2, atol=1e-4, rtol=1e-4), "case 2 mismatch"

    # Case 3: lane-aligned chunked (transposed) scratch + chunked-H contraction.
    B3, L3, H3 = 4, 300, 160
    hidden3 = jax.random.normal(ks[4], (1, B3, H3), dtype=jnp.float32)
    enc3 = jax.random.normal(ks[5], (L3, B3, H3), dtype=jnp.float32)
    out3 = jax.block_until_ready(attention_dot(hidden3, enc3, l_tile=128, h_step=128))
    ref3 = attention_dot_ref(hidden3, enc3)
    assert out3.shape == (B3, 1, L3), out3.shape
    assert jnp.allclose(out3, ref3, atol=1e-4, rtol=1e-4), "case 3 mismatch"

    # Case 4: bf16 inputs (sublane packing 16, f32 in-kernel accumulation).
    B4, L4, H4 = 8, 24, 64
    hidden4 = jax.random.normal(ks[6], (1, B4, H4), dtype=jnp.bfloat16)
    enc4 = jax.random.normal(ks[7], (L4, B4, H4), dtype=jnp.bfloat16)
    out4 = jax.block_until_ready(attention_dot(hidden4, enc4))
    ref4 = attention_dot_ref(hidden4.astype(jnp.float32), enc4.astype(jnp.float32))
    assert out4.shape == (B4, 1, L4), out4.shape
    assert jnp.allclose(out4.astype(jnp.float32), ref4, atol=2e-2, rtol=2e-2), \
        "case 4 mismatch"

    print("KERNEL_OK")
</pallas_src>

<mosaic_0001>
module attributes {stable_mosaic.version = 11 : i64} {
  func.func @_attn_dot_kernel(%arg0: i32, %arg1: i32, %arg2: memref<1x2x32xf32, #tpu.memory_space<vmem>>, %arg3: memref<8x2x32xf32, #tpu.memory_space<vmem>>, %arg4: memref<2x8xf32, #tpu.memory_space<vmem>>, %arg5: memref<2x8xf32, #tpu.memory_space<vmem>>) attributes {dimension_semantics = [#tpu.dimension_semantics<parallel>, #tpu.dimension_semantics<arbitrary>], iteration_bounds = array<i64: 1, 1>, scalar_prefetch = 0 : i64, scratch_operands = 1 : i64, tpu.core_type = #tpu.core_type<tc>, window_params = [{transform_indices = @transform_0, window_bounds = array<i64: 1, 2, 32>}, {transform_indices = @transform_1, window_bounds = array<i64: 8, 2, 32>}, {transform_indices = @transform_2, window_bounds = array<i64: 2, 8>}]} {
    %c0 = arith.constant 0 : index
    %c0_0 = arith.constant 0 : index
    %c0_1 = arith.constant 0 : index
    %0 = vector.load %arg2[%c0, %c0_0, %c0_1] : memref<1x2x32xf32, #tpu.memory_space<vmem>>, vector<1x2x32xf32>
    %cst = arith.constant 0.000000e+00 : f32
    %1 = vector.broadcast %cst : f32 to vector<8x2xf32>
    %c0_2 = arith.constant 0 : index
    %c0_3 = arith.constant 0 : index
    %c0_4 = arith.constant 0 : index
    %2 = vector.load %arg3[%c0_2, %c0_3, %c0_4] : memref<8x2x32xf32, #tpu.memory_space<vmem>>, vector<8x2x32xf32>
    %3 = vector.broadcast %0 : vector<1x2x32xf32> to vector<8x2x32xf32>
    %4 = arith.mulf %2, %3 : vector<8x2x32xf32>
    %cst_5 = arith.constant dense<0.000000e+00> : vector<8x2xf32>
    %5 = vector.multi_reduction <add>, %4, %cst_5 [2] : vector<8x2x32xf32> to vector<8x2xf32>
    %6 = arith.addf %1, %5 : vector<8x2xf32>
    %7 = tpu.transpose %6, [1, 0] : vector<8x2xf32> -> vector<2x8xf32>
    %c0_6 = arith.constant 0 : index
    %c0_7 = arith.constant 0 : index
    %8 = vector.load %arg5[%c0_6, %c0_7] : memref<2x8xf32, #tpu.memory_space<vmem>>, vector<2x8xf32>
    tpu.vector_store %arg5[%c0_6, %c0_7], %7 {strides = array<i32>} : memref<2x8xf32, #tpu.memory_space<vmem>>, vector<2x8xf32>,
    %c0_i32 = arith.constant 0 : i32
    %9 = arith.cmpi eq, %arg1, %c0_i32 : i32
    %10 = arith.extui %9 : i1 to i32
    %c0_i32_8 = arith.constant 0 : i32
    %11 = arith.cmpi ne, %10, %c0_i32_8 : i32
    scf.if %11 {
      %c0_9 = arith.constant 0 : index
      %c0_10 = arith.constant 0 : index
      %12 = vector.load %arg5[%c0_9, %c0_10] : memref<2x8xf32, #tpu.memory_space<vmem>>, vector<2x8xf32>
      %cst_11 = arith.constant dense<0xFF800000> : vector<2xf32>
      %13 = vector.multi_reduction <maximumf>, %12, %cst_11 [1] : vector<2x8xf32> to vector<2xf32>
      %14 = vector.shape_cast %13 : vector<2xf32> to vector<2x1xf32>
      %15 = vector.broadcast %14 : vector<2x1xf32> to vector<2x8xf32>
      %16 = arith.subf %12, %15 : vector<2x8xf32>
      %17 = math.exp %16 : vector<2x8xf32>
      %cst_12 = arith.constant dense<0.000000e+00> : vector<2xf32>
      %18 = vector.multi_reduction <add>, %17, %cst_12 [1] : vector<2x8xf32> to vector<2xf32>
      %19 = vector.shape_cast %18 : vector<2xf32> to vector<2x1xf32>
      %20 = tpu.reciprocal %19 {approx = true} : vector<2x1xf32> -> vector<2x1xf32>
      %21 = arith.mulf %19, %20 : vector<2x1xf32>
      %cst_13 = arith.constant 2.000000e+00 : f32
      %22 = vector.broadcast %cst_13 : f32 to vector<2x1xf32>
      %23 = arith.subf %22, %21 : vector<2x1xf32>
      %24 = arith.mulf %20, %23 : vector<2x1xf32>
      %25 = vector.broadcast %24 : vector<2x1xf32> to vector<2x8xf32>
      %26 = arith.mulf %17, %25 : vector<2x8xf32>
      %c0_14 = arith.constant 0 : index
      %c0_15 = arith.constant 0 : index
      %27 = vector.load %arg4[%c0_14, %c0_15] : memref<2x8xf32, #tpu.memory_space<vmem>>, vector<2x8xf32>
      tpu.vector_store %arg4[%c0_14, %c0_15], %26 {strides = array<i32>} : memref<2x8xf32, #tpu.memory_space<vmem>>, vector<2x8xf32>,
    } else {
    }
    return
  }
  func.func @transform_0(%arg0: i32, %arg1: i32) -> (i32, i32, i32) {
    %c0_i32 = arith.constant 0 : i32
    %c0_i32_0 = arith.constant 0 : i32
    %c0_i32_1 = arith.constant 0 : i32
    return %c0_i32, %arg0, %c0_i32_0 : i32, i32, i32
  }
  func.func @transform_1(%arg0: i32, %arg1: i32) -> (i32, i32, i32) {
    %c0_i32 = arith.constant 0 : i32
    %c0_i32_0 = arith.constant 0 : i32
    return %arg1, %arg0, %c0_i32 : i32, i32, i32
  }
  func.func @transform_2(%arg0: i32, %arg1: i32) -> (i32, i32) {
    %c0_i32 = arith.constant 0 : i32
    %c0_i32_0 = arith.constant 0 : i32
    return %arg0, %c0_i32 : i32, i32
  }
}

</mosaic_0001>

<bundles_post_ra>
// kernel: tpu_custom_call.1
= control target key start
LH: loop header
LB: loop body
LE: loop exit
PB: predicated region body
PF: predicated region fallthrough
CT: control target
= control target key end

     0   :  { %7 = vsyncpa [#allocation4], 0  ;;  %s326_s0 = inlined_call_operand.hbm [shape: f32[1,2,32], index: 0, kind: input, shape index: {}]   ;;  %s327_s1 = inlined_call_operand.hbm [shape: f32[8,2,32], index: 1, kind: input, shape index: {}]   ;;  %s328_s2 = inlined_call_operand.hbm [shape: f32[2,8], index: 2, kind: output, shape index: {}]  }
   0x1   :  { %8 = vsyncpa [#allocation7], 0 }
   0x2   :  { %9 = vsyncpa [#allocation5], 0  ;;  %s15_s11 = sshll.u32 %s326_s0, 4  ;;  %s285_s12 = smov [#allocation3]   ;;  %s16_s11 = int_to_ptr.hbm [resolvable:$true] %s15_s11 }
   0x3   :  { %s17_s13 = sshll.u32 %s285_s12, 4  ;;  %s25_s16 = sshll.u32 %s327_s1, 4  ;;  %s18_s13 = int_to_ptr.vmem [resolvable:$true] %s17_s13  ;;  %s26_s16 = int_to_ptr.hbm [resolvable:$true] %s25_s16 }
   0x4   :  { %20 = dma.hbm_to_vmem [thread:$0]  %s16_s11, 32, %s18_s13, [#allocation4]  }
   0x5   :  { %s286_s17 = smov [#allocation6]   ;;  %s287_s19 = smov 32  }
   0x6   :  { %s27_s18 = sshll.u32 %s286_s17, 4  ;;  %s288_s20 = smov 2   ;;  %s28_s18 = int_to_ptr.vmem [resolvable:$true] %s27_s18 }
   0x7   :  { %33 = dma.hbm_to_vmem [thread:$0]  %s26_s16, 256, %s28_s18, [#allocation7], %s287_s19, %s287_s19, %s288_s20  }
   0x8   :  { %279 = dma.done.wait [#allocation4], 32  }
   0x9   :  { %280 = vsyncadd [#allocation4], 4294967264 }
   0xa   :  { %281 = dma.done.wait [#allocation7], 256  }
   0xb   :  { %282 = vsyncadd [#allocation7], 4294967040  ;;  %vm59_vm0 = vcmask 254976   ;;  %v42_v0 = vld [vmem:[#allocation3] sm:$0x3]  ;;  %v100_v27 = vlaneseq  ;;  %vm110_vm1 = vcmask 1041409  }
   0xc   :  { %v43_v1 = vld [vmem:[#allocation6] sm:$0x3]  ;;  %v45_v2 = vld [vmem:[#allocation6 + $0x4] sm:$0x3]  ;;  %v47_v5 = vld [vmem:[#allocation6 + $0x8] sm:$0x3] }
   0xd   :  { %v51_v3 = vmul.f32 %v43_v1, %v42_v0  ;;  %v53_v4 = vmul.f32 %v45_v2, %v42_v0  ;;  %v55_v6 = vmul.f32 %v47_v5, %v42_v0  ;;  %v44_v7 = vld [vmem:[#allocation6 + $0x2] sm:$0x3]  ;;  %v46_v8 = vld [vmem:[#allocation6 + $0x6] sm:$0x3]  ;;  %v48_v11 = vld [vmem:[#allocation6 + $0xa] sm:$0x3] }
   0xe   :  { %v52_v13 = vmul.f32 %v44_v7, %v42_v0  ;;  %v54_v14 = vmul.f32 %v46_v8, %v42_v0  ;;  %v56_v15 = vmul.f32 %v48_v11, %v42_v0  ;;  %v49_v19 = vld [vmem:[#allocation6 + $0xc] sm:$0x3]  ;;  %v50_v20 = vld [vmem:[#allocation6 + $0xe] sm:$0x3]  ;;  %v101_v29 = vand.u32 127, %v100_v27  ;;  %s289_s0 = smov [#allocation8]  }
   0xf   :  { %v60_v9 = vsel %vm59_vm0, %v51_v3, 0.0  ;;  %v66_v10 = vsel %vm59_vm0, %v53_v4, 0.0  ;;  %v72_v12 = vsel %vm59_vm0, %v55_v6, 0.0  ;;  %v57_v21 = vmul.f32 %v49_v19, %v42_v0  ;;  %s184_s1 = sshll.u32 %s289_s0, 4  ;;  %s186_s23 = sshll.u32 %s328_s2, 4  ;;  %s185_s1 = int_to_ptr.vmem [resolvable:$true] %s184_s1  ;;  %s187_s23 = int_to_ptr.hbm [resolvable:$true] %s186_s23 }
  0x10   :  { %61 = vadd.xlane.f32.xlu0 %v60_v9  ;;  %67 = vadd.xlane.f32.xlu1 %v66_v10  ;;  %v63_v16 = vsel %vm59_vm0, %v52_v13, 0.0  ;;  %v69_v17 = vsel %vm59_vm0, %v54_v14, 0.0  ;;  %v75_v18 = vsel %vm59_vm0, %v56_v15, 0.0  ;;  %v58_v22 = vmul.f32 %v50_v20, %v42_v0 }
  0x11   :  { %73 = vadd.xlane.f32.xlu2 %v72_v12  ;;  %v78_v23 = vsel %vm59_vm0, %v57_v21, 0.0  ;;  %vm112_vm2 = vcmask 1042434   ;;  %vm114_vm3 = vcmask 1043459   ;;  %vm116_vm4 = vcmask 1044484  }
  0x12   :  { %v81_v24 = vsel %vm59_vm0, %v58_v22, 0.0  ;;  %vm118_vm5 = vcmask 1045509   ;;  %vm120_vm6 = vcmask 1046534   ;;  %vm122_vm7 = vcmask 1047559  }
  0x13   :  { %vm157_vm8 = vcmask 58368  }
  0x18   :  { %64 = vadd.xlane.f32.xlu0 %v63_v16  ;;  %70 = vadd.xlane.f32.xlu1 %v69_v17 }
  0x19   :  { %76 = vadd.xlane.f32.xlu2 %v75_v18 }
  0x20   :  { %79 = vadd.xlane.f32.xlu0 %v78_v23  ;;  %82 = vadd.xlane.f32.xlu1 %v81_v24 }
  0x83   :  { %v62_v25 = vpop.xlane.xlu0 %61  ;;  %v68_v26 = vpop.xlane.xlu1 %67 }
  0x84   :  { %v74_v28 = vpop.xlane.xlu2 %73  ;;  %v102_v32 = vperm.slane %v62_v25, %v101_v29  ;;  %v104_v35 = vperm.slane %v68_v26, %v101_v29 }
  0x85   :  { %v106_v39 = vperm.slane %v74_v28, %v101_v29 }
  0x8b   :  { %v65_v30 = vpop.xlane.xlu0 %64  ;;  %v71_v31 = vpop.xlane.xlu1 %70 }
  0x8c   :  { %v103_v33 = vperm.slane %v65_v30, %v101_v29  ;;  %v105_v34 = vperm.slane %v71_v31, %v101_v29  ;;  %v77_v37 = vpop.xlane.xlu2 %76 }
  0x8d   :  { %v107_v41 = vperm.slane %v77_v37, %v101_v29 }
  0x8e   :  { %v111_v36 = vsel %vm110_vm1, %v103_v33, %v102_v32 }
  0x8f   :  { %v113_v38 = vsel %vm112_vm2, %v104_v35, %v111_v36 }
  0x90   :  { %v115_v40 = vsel %vm114_vm3, %v105_v34, %v113_v38 }
  0x91   :  { %v117_v42 = vsel %vm116_vm4, %v106_v39, %v115_v40 }
  0x92   :  { %v119_v47 = vsel %vm118_vm5, %v107_v41, %v117_v42 }
  0x93   :  { %v80_v43 = vpop.xlane.xlu0 %79  ;;  %v83_v44 = vpop.xlane.xlu1 %82 }
  0x94   :  { %v108_v45 = vperm.slane %v80_v43, %v101_v29  ;;  %v109_v46 = vperm.slane %v83_v44, %v101_v29 }
  0x96   :  { %v121_v48 = vsel %vm120_vm6, %v108_v45, %v119_v47 }
  0x97   :  { %v123_v49 = vsel %vm122_vm7, %v109_v46, %v121_v48 }
  0x98   :  { %125 = vxpose.xlu2.b32.start.end [1/1] (short) (narrow) %v123_v49, 8 }
 0x131   :  { %v141_v50 = vpop.trf.xlu2 }
 0x132   :  { %158 = vst.msk [vmem:[#allocation2] sm:$0x3] %vm157_vm8, %v141_v50 }
 0x139   :  { %v163_v51 = vld [vmem:[#allocation2] sm:$0x3] }
 0x13a   :  { %v164_v52 = vsel %vm157_vm8, %v163_v51, -inf }
 0x13b   :  { %165 = vmax.xlane.f32.xlu0 %v164_v52 }
 0x1ae   :  { %v166_v53 = vpop.xlane.xlu0 %165 }
 0x1af   :  { %v167_v54 = vsub.f32 %v163_v51, %v166_v53 }
 0x1b1   :  { %v168_v55 = vmul.f32 1.442695, %v167_v54 }
 0x1b3   :  { %203 = vpow2.f32 %v168_v55 }
 0x1b9   :  { %v204_v56 = vpop.eup %203 }
 0x1ba   :  { %v170_v57 = vsel %vm157_vm8, %v204_v56, 0.0 }
 0x1bb   :  { %171 = vadd.xlane.f32.xlu1 %v170_v57 }
 0x22e   :  { %v172_v58 = vpop.xlane.xlu1 %171 }
 0x22f   :  { %205 = vrcp.f32 %v172_v58 }
 0x235   :  { %v206_v59 = vpop.eup %205 }
 0x236   :  { %v174_v60 = vmul.f32 %v206_v59, %v172_v58 }
 0x238   :  { %v175_v61 = vsub.f32 2.0, %v174_v60 }
 0x23a   :  { %v176_v62 = vmul.f32 %v206_v59, %v175_v61 }
 0x23c   :  { %v177_v63 = vmul.f32 %v204_v56, %v176_v62 }
 0x23e   :  { %178 = vst.msk [vmem:[#allocation8] sm:$0x3] %vm157_vm8, %v177_v63 }
 0x23f   :  { %189 = dma.vmem_to_hbm [thread:$0]  %s185_s1, 32, %s187_s23, [#allocation5]  }
 0x240   :  { %283 = dma.done.wait [#allocation5], 32  }
 0x241   :  { %284 = vsyncadd [#allocation5], 4294967264 }
 0x242   :  { %194 = vsyncpa [#allocation4], 1 }
 0x243   :  { %195 = vsyncpa [#allocation7], 1 }
 0x244   :  { %196 = vsyncpa [#allocation5], 1 }

</bundles_post_ra>
